<compile_context>
chip_gen: v7x
topology: tpu7x:2x2x1
jax: 0.10.0
libtpu: 0.0.40
codegen_flags: <defaults>
</compile_context>

<pallas_src>
import math

import jax
import jax.numpy as jnp
from jax.experimental import pallas as pl
from jax.experimental.pallas import tpu as pltpu

_LANE = 128
_TARGET_TILE_BYTES = 4 << 20   # ~4 MiB per input tile (>=85% of HBM roofline)
_MIN_SPLIT_BYTES = 2 << 20     # only force multiple grid steps past this size


def _drop_path_kernel(scale_ref, x_ref, o_ref):
    # scale_ref: (TB, 1) f32 VMEM — per-sample multiplier (0 or 1/keep_prob)
    # x_ref / o_ref: (TB, TN) tile of the flattened activations
    s = scale_ref[...]                                    # (TB, 1) f32
    o_ref[...] = (x_ref[...].astype(jnp.float32) * s).astype(o_ref.dtype)


def drop_path_pallas(x, drop_prob: float = 0.0, training: bool = False, *,
                     key=None, donate_input: bool = False):
    """Per-sample stochastic depth, matching timm/torch drop_path semantics."""
    if drop_prob == 0.0 or not training:
        return x
    if drop_prob >= 1.0:
        # torch's x.div(0) * mask would produce NaN; all paths dropped -> zeros.
        return jnp.zeros_like(x)
    if key is None:
        raise ValueError("drop_path_pallas: a PRNG `key` is required when "
                         "training with drop_prob > 0")

    keep_prob = 1.0 - drop_prob
    B = x.shape[0]

    # Per-sample binary mask, same recipe as torch: floor(keep_prob + U[0,1)).
    u = jax.random.uniform(key, (B,), dtype=jnp.float32)
    mask = jnp.floor(keep_prob + u)
    scale = (mask / keep_prob).astype(jnp.float32).reshape(B, 1)  # (B, 1) f32

    orig_shape = x.shape
    N = int(math.prod(x.shape[1:])) if x.ndim > 1 else 1
    x2 = x.reshape(B, N)

    itemsize = jnp.dtype(x.dtype).itemsize

    # --- tile-size selection ------------------------------------------------
    # Sublane (batch) tile: dtype-aware packed multiple (8/16/32 rows), or the
    # full batch dim when B is smaller than one packed tile.
    packing = max(1, 4 // itemsize)            # 1 f32, 2 bf16, 4 int8/fp8
    sub_mult = 8 * packing
    tb = sub_mult if B >= sub_mult else B

    # Lane (feature) tile: multiple of 128, bounded by the feature extent and
    # the per-tile byte target.
    n128 = _LANE * pl.cdiv(N, _LANE)
    max_tn = max(_LANE, (_TARGET_TILE_BYTES // max(1, tb * itemsize)) // _LANE * _LANE)
    tn = min(n128, max_tn)

    # If the whole feature axis already fits in one lane-tile, grow the batch
    # tile (in packed multiples) toward the byte target instead.
    if tn == n128:
        while tb + sub_mult <= B and (tb + sub_mult) * tn * itemsize <= _TARGET_TILE_BYTES:
            tb += sub_mult

    # Keep at least a few grid steps on non-trivial tensors so both v7x
    # TensorCores get work (grid axes are "parallel").
    if B * N * itemsize >= _MIN_SPLIT_BYTES:
        while pl.cdiv(B, tb) * pl.cdiv(N, tn) < 4 and tn > _LANE:
            half = pl.cdiv(tn // 2, _LANE) * _LANE
            if half == tn:
                break
            tn = half

    grid = (pl.cdiv(B, tb), pl.cdiv(N, tn))

    # Double-buffered footprint ~ 2*(in + out) tiles + per-sample scales.
    tile_bytes = tb * tn * itemsize
    vmem_limit = min(96 << 20, max(32 << 20, 4 * tile_bytes + (2 << 20)))

    out = pl.pallas_call(
        _drop_path_kernel,
        out_shape=jax.ShapeDtypeStruct((B, N), x.dtype),
        grid=grid,
        in_specs=[
            # (TB, 1) f32 per-sample scale, broadcast against the data tile.
            pl.BlockSpec((tb, 1), lambda i, j: (i, 0)),
            # (TB, TN) lane-dense activation tile; ragged boundary blocks are
            # masked by Pallas (no host-side pad / slice passes).
            pl.BlockSpec((tb, tn), lambda i, j: (i, j)),
        ],
        out_specs=pl.BlockSpec((tb, tn), lambda i, j: (i, j)),
        compiler_params=pltpu.CompilerParams(
            dimension_semantics=("parallel", "parallel"),
            vmem_limit_bytes=vmem_limit),
        input_output_aliases=({1: 0} if donate_input else {}),
    )(scale, x2)

    return out.reshape(orig_shape)


def _drop_path_ref(x, drop_prob, key):
    """Plain-JAX reference using the same mask recipe as the kernel wrapper."""
    keep_prob = 1.0 - drop_prob
    u = jax.random.uniform(key, (x.shape[0],), dtype=jnp.float32)
    mask = jnp.floor(keep_prob + u)
    scale = (mask / keep_prob).reshape((-1,) + (1,) * (x.ndim - 1))
    return (x.astype(jnp.float32) * scale).astype(x.dtype)


if __name__ == "__main__":
    key = jax.random.PRNGKey(0)
    k_x, k_m, k_x2, k_m2, k_x3, k_m3 = jax.random.split(key, 6)

    drop_prob = 0.25

    # Small NCHW input consistent with how DropPath is used in GVTNet blocks.
    x = jax.random.normal(k_x, (2, 4, 16, 16), dtype=jnp.float32)

    # eval mode / drop_prob == 0 -> identity
    y_eval = drop_path_pallas(x, drop_prob, training=False)
    assert jnp.allclose(y_eval, x)

    # training mode -> per-sample stochastic depth
    y = jax.block_until_ready(drop_path_pallas(x, drop_prob, training=True, key=k_m))
    y_ref = _drop_path_ref(x, drop_prob, k_m)
    assert jnp.allclose(y, y_ref, atol=1e-6, rtol=1e-6)

    # Non-128-aligned feature size (exercises the masked boundary block).
    x_odd = jax.random.normal(k_x2, (2, 3, 7, 7), dtype=jnp.float32)
    y_odd = jax.block_until_ready(drop_path_pallas(x_odd, drop_prob, training=True, key=k_m2))
    y_odd_ref = _drop_path_ref(x_odd, drop_prob, k_m2)
    assert jnp.allclose(y_odd, y_odd_ref, atol=1e-6, rtol=1e-6)

    # bf16 path (dtype-aware 16-row sublane tile).
    x_bf = jax.random.normal(k_x3, (16, 4, 16, 16), dtype=jnp.float32).astype(jnp.bfloat16)
    y_bf = jax.block_until_ready(drop_path_pallas(x_bf, drop_prob, training=True, key=k_m3))
    y_bf_ref = _drop_path_ref(x_bf, drop_prob, k_m3)
    assert jnp.allclose(y_bf.astype(jnp.float32), y_bf_ref.astype(jnp.float32),
                        atol=1e-2, rtol=1e-2)

    # drop_prob == 1.0 -> all paths dropped, zero output (no NaN).
    y_zero = drop_path_pallas(x, 1.0, training=True, key=k_m)
    assert jnp.all(y_zero == 0)

    print("KERNEL_OK")
</pallas_src>

<mosaic_0001>
module attributes {stable_mosaic.version = 11 : i64} {
  func.func @_drop_path_kernel(%arg0: i32, %arg1: i32, %arg2: memref<2x1xf32, #tpu.memory_space<vmem>>, %arg3: memref<2x1024xf32, #tpu.memory_space<vmem>>, %arg4: memref<2x1024xf32, #tpu.memory_space<vmem>>) attributes {dimension_semantics = [#tpu.dimension_semantics<parallel>, #tpu.dimension_semantics<parallel>], iteration_bounds = array<i64: 1, 1>, scalar_prefetch = 0 : i64, scratch_operands = 0 : i64, tpu.core_type = #tpu.core_type<tc>, window_params = [{transform_indices = @transform_0, window_bounds = array<i64: 2, 1>}, {transform_indices = @transform_1, window_bounds = array<i64: 2, 1024>}, {transform_indices = @transform_2, window_bounds = array<i64: 2, 1024>}]} {
    %c0 = arith.constant 0 : index
    %c0_0 = arith.constant 0 : index
    %0 = vector.load %arg2[%c0, %c0_0] : memref<2x1xf32, #tpu.memory_space<vmem>>, vector<2x1xf32>
    %c0_1 = arith.constant 0 : index
    %c0_2 = arith.constant 0 : index
    %1 = vector.load %arg3[%c0_1, %c0_2] : memref<2x1024xf32, #tpu.memory_space<vmem>>, vector<2x1024xf32>
    %2 = vector.broadcast %0 : vector<2x1xf32> to vector<2x1024xf32>
    %3 = arith.mulf %1, %2 : vector<2x1024xf32>
    %c0_3 = arith.constant 0 : index
    %c0_4 = arith.constant 0 : index
    %4 = vector.load %arg4[%c0_3, %c0_4] : memref<2x1024xf32, #tpu.memory_space<vmem>>, vector<2x1024xf32>
    tpu.vector_store %arg4[%c0_3, %c0_4], %3 {strides = array<i32>} : memref<2x1024xf32, #tpu.memory_space<vmem>>, vector<2x1024xf32>,
    return
  }
  func.func @transform_0(%arg0: i32, %arg1: i32) -> (i32, i32) {
    %c0_i32 = arith.constant 0 : i32
    %c0_i32_0 = arith.constant 0 : i32
    return %arg0, %c0_i32 : i32, i32
  }
  func.func @transform_1(%arg0: i32, %arg1: i32) -> (i32, i32) {
    %c0_i32 = arith.constant 0 : i32
    return %arg0, %arg1 : i32, i32
  }
  func.func @transform_2(%arg0: i32, %arg1: i32) -> (i32, i32) {
    %c0_i32 = arith.constant 0 : i32
    return %arg0, %arg1 : i32, i32
  }
}

</mosaic_0001>

<bundles_post_ra>
// kernel: tpu_custom_call.1
= control target key start
LH: loop header
LB: loop body
LE: loop exit
PB: predicated region body
PF: predicated region fallthrough
CT: control target
= control target key end

     0   :  { %7 = vsyncpa [#allocation3], 0  ;;  %s157_s0 = inlined_call_operand.vmem [shape: f32[2,1], index: 0, kind: input, shape index: {}]   ;;  %s158_s1 = inlined_call_operand.hbm [shape: f32[2,1024], index: 1, kind: input, shape index: {}]   ;;  %s159_s2 = inlined_call_operand.hbm [shape: f32[2,1024], index: 2, kind: output, shape index: {}]  }
   0x1   :  { %8 = vsyncpa [#allocation4], 0  ;;  %s111_s9 = smov [#allocation2]   ;;  %s63_s13 = scalar_lea.hbm %s158_s1, 256 }
   0x2   :  { %s17_s10 = sshll.u32 %s111_s9, 4  ;;  %p64_p0 = scmp.ne.s32.totalorder %s158_s1, %s63_s13  ;;  %s18_s10 = int_to_ptr.vmem [resolvable:$true] %s17_s10 }
   0x3   :  { %p67_p1 = scmp.lt.u32.totalorder %s63_s13, %s158_s1 }
   0x5   :  { %p69_p2 = pnand %p67_p1, %p64_p0 }
   0x7   :  { %72 = shalt.err (!%p69_p2)
}
   0x8   :  { %s73_s18 = scalar_lea.vmem %s18_s10, 256  ;;  %p78_p4 = scmp.lt.s32.totalorder %s18_s10, %s18_s10 }
   0x9   :  { %p74_p3 = scmp.ne.s32.totalorder %s18_s10, %s73_s18  ;;  %p79_p5 = scmp.lt.s32.totalorder %s73_s18, %s73_s18 }
   0xb   :  { %p80_p6 = por %p79_p5, %p78_p4 }
   0xd   :  { %p81_p7 = pnand %p80_p6, %p74_p3 }
   0xf   :  { %84 = shalt.err (!%p81_p7)
}
  0x10   :  { %20 = dma.hbm_to_vmem [thread:$0]  %s158_s1, 256, %s18_s10, [#allocation3]  }
  0x11   :  { %107 = dma.done.wait [#allocation3], 256  }
  0x12   :  { %108 = vsyncadd [#allocation3], 4294967040  ;;  %v112_v0 = vmov 0   ;;  %v24_v1 = vld [vmem:[%s157_s0] sm:$0x3]  ;;  %v34_v4 = vlaneseq  ;;  %v26_v9 = vld [vmem:[#allocation2 + $0x8] sm:$0xff] }
  0x13   :  { %62 = vset.pattern.permute.xlu0 %v112_v0  ;;  %v113_v2 = vmov 269488144   ;;  %v25_v8 = vld [vmem:[#allocation2] sm:$0xff]  ;;  %s114_s23 = smov [#allocation5]  }
  0x14   :  { %29 = vperm.xlu0 %62, %v24_v1   ;;  %v32_v3 = vunpack.c.l.s4 %v113_v2  ;;  %v35_v6 = vshrl.u32 %v34_v4, 7  ;;  %s49_s1 = sshll.u32 %s114_s23, 4  ;;  %s50_s1 = int_to_ptr.vmem [resolvable:$true] %s49_s1 }
  0x15   :  { %s85_s24 = scalar_lea.vmem %s50_s1, 256  ;;  %p90_p9 = scmp.lt.s32.totalorder %s50_s1, %s50_s1 }
  0x16   :  { %v33_v5 = vunpack.c.0.s8 %v32_v3  ;;  %p86_p8 = scmp.ne.s32.totalorder %s50_s1, %s85_s24  ;;  %p91_p10 = scmp.lt.s32.totalorder %s85_s24, %s85_s24 }
  0x18   :  { %v36_v7 = vsub.s32 %v33_v5, %v35_v6  ;;  %p92_p11 = por %p91_p10, %p90_p9 }
  0x1a   :  { %p93_p12 = pnand %p92_p11, %p86_p8 }
  0x93   :  { %v30_v10 = vpop.permute.xlu0 %29 }
  0x94   :  { %v37_v11 = vrot.slane %v30_v10, %v36_v7 }
  0x96   :  { %v39_v12 = vmul.f32 %v37_v11, %v25_v8  ;;  %v40_v13 = vmul.f32 %v37_v11, %v26_v9 }
  0x98   :  { %41 = vst [vmem:[#allocation5] sm:$0xff] %v39_v12  ;;  %42 = vst [vmem:[#allocation5 + $0x8] sm:$0xff] %v40_v13 }
  0x99   :  { %96 = shalt.err (!%p93_p12)
}
  0x9a   :  { %s97_s26 = scalar_lea.hbm %s159_s2, 256 }
  0x9b   :  { %p98_p13 = scmp.ne.s32.totalorder %s159_s2, %s97_s26  ;;  %p101_p0 = scmp.lt.u32.totalorder %s97_s26, %s159_s2 }
  0x9d   :  { %p103_p1 = pnand %p101_p0, %p98_p13 }
  0x9f   :  { %106 = shalt.err (!%p103_p1)
}
  0xa0   :  { %52 = dma.vmem_to_hbm [thread:$0]  %s50_s1, 256, %s159_s2, [#allocation4]  }
  0xa1   :  { %109 = dma.done.wait [#allocation4], 256  }
  0xa2   :  { %110 = vsyncadd [#allocation4], 4294967040 }
  0xa3   :  { %56 = vsyncpa [#allocation3], 1 }
  0xa4   :  { %57 = vsyncpa [#allocation4], 1 }

</bundles_post_ra>
